<compile_context>
chip_gen: v7x
topology: tpu7x:2x2x1
jax: 0.10.0
libtpu: 0.0.40
codegen_flags: <defaults>
</compile_context>

<pallas_src>
import jax
import jax.numpy as jnp
from jax.experimental import pallas as pl
from jax.experimental.pallas import tpu as pltpu

_K_PAD = 128  # lane-dense contraction width (9*Cin + 1 bias column, padded to 128)


def _model_kernel(x_ref, w_ref, pool_ref, wcls_ref, bcls_ref, o_ref):
    # One grid step == TB examples.
    # x_ref:    (TB*HW, K_PAD)  im2col patches + ones column, zero-padded to 128
    # w_ref:    (K_PAD, Cout)   packed conv weights + conv-bias row, zero-padded
    # pool_ref: (TB, TB*HW)     block-diagonal mean-pooling matrix (1/HW entries)
    # wcls_ref: (Cout, 1)       classifier weight
    # bcls_ref: (1, 1)          classifier bias
    # o_ref:    (TB, 1)         per-example logits
    #
    # Conv(3x3, pad=1) + bias as ONE lane-dense MXU matmul, then ReLU (VPU).
    h = jnp.maximum(
        jnp.dot(x_ref[...], w_ref[...], preferred_element_type=jnp.float32), 0.0)

    # AdaptiveAvgPool2d(1) for all TB examples at once: block-diagonal pooling
    # matmul rides the MXU instead of an XLU cross-sublane reduction.
    feat = jnp.dot(pool_ref[...], h, preferred_element_type=jnp.float32)   # (TB, Cout)

    # Linear(Cout, 1) + bias.
    logit = jnp.dot(feat, wcls_ref[...],
                    preferred_element_type=jnp.float32) + bcls_ref[...]    # (TB, 1)
    o_ref[...] = logit.astype(o_ref.dtype)


def prepare_params(w_conv, b_conv, w_cls, b_cls):
    """One-time static weight repacking (outside the per-call hot path)."""
    Cout, Cin, kh, kw = w_conv.shape
    # (Cout, Cin, 3, 3) -> (di, dj, cin, cout) -> (9*Cin, Cout); row order
    # (di*3 + dj)*Cin + cin matches the im2col column order built below.
    w_taps = jnp.transpose(w_conv, (2, 3, 1, 0)).reshape(kh * kw * Cin, Cout)
    # Fold the conv bias in as an extra weight row (pairs with a ones column).
    w_packed = jnp.concatenate([w_taps, b_conv.reshape(1, Cout)], axis=0)
    assert w_packed.shape[0] <= _K_PAD, "9*Cin + 1 must fit in the padded K"
    w_packed = jnp.pad(w_packed, ((0, _K_PAD - w_packed.shape[0]), (0, 0)))
    w_cls2d = w_cls.reshape(Cout, 1)   # PyTorch Linear weight is (1, Cout)
    b_cls2d = b_cls.reshape(1, 1)
    return w_packed, w_cls2d, b_cls2d


@jax.jit
def model_forward(x_nchw, w_packed, w_cls2d, b_cls2d):
    """x_nchw: (B, Cin, H, W) float32.  Returns (B,) float32 logits."""
    B, Cin, H, W = x_nchw.shape
    Cout = w_packed.shape[1]
    HW = H * W

    # im2col in the wrapper: NCHW -> NHWC, zero-pad spatial dims by 1, gather
    # the 9 shifted windows, append a ones column (folded conv bias), and
    # zero-pad K to 128 so the kernel sees a lane-dense matmul operand.
    x_nhwc = jnp.transpose(x_nchw, (0, 2, 3, 1))
    x_pad = jnp.pad(x_nhwc, ((0, 0), (1, 1), (1, 1), (0, 0)))
    taps = [x_pad[:, di:di + H, dj:dj + W, :]
            for di in range(3) for dj in range(3)]
    x_col = jnp.concatenate(taps, axis=-1).reshape(B, HW, 9 * Cin)
    x_col = jnp.concatenate([x_col, jnp.ones((B, HW, 1), x_col.dtype)], axis=-1)
    x_col = jnp.pad(x_col, ((0, 0), (0, 0), (0, _K_PAD - x_col.shape[-1])))

    # Batch tiling: TB examples per grid step.  Small batches run in a single
    # step; large batches are padded to a multiple of TB (padded rows are zero
    # and their outputs are discarded below).
    TB = B if B <= 8 else 8
    B_pad = -(-B // TB) * TB
    if B_pad != B:
        x_col = jnp.pad(x_col, ((0, B_pad - B), (0, 0), (0, 0)))
    x_flat = x_col.reshape(B_pad * HW, _K_PAD)

    # Block-diagonal mean-pooling matrix (shape-only -> constant-folded by XLA).
    pool = jnp.kron(jnp.eye(TB, dtype=jnp.float32),
                    jnp.full((1, HW), 1.0 / HW, dtype=jnp.float32))  # (TB, TB*HW)

    out = pl.pallas_call(
        _model_kernel,
        out_shape=jax.ShapeDtypeStruct((B_pad, 1), jnp.float32),
        grid=(B_pad // TB,),
        in_specs=[
            pl.BlockSpec((TB * HW, _K_PAD), lambda i: (i, 0)),
            pl.BlockSpec((_K_PAD, Cout), lambda i: (0, 0)),
            pl.BlockSpec((TB, TB * HW), lambda i: (0, 0)),
            pl.BlockSpec((Cout, 1), lambda i: (0, 0)),
            pl.BlockSpec((1, 1), lambda i: (0, 0)),
        ],
        out_specs=pl.BlockSpec((TB, 1), lambda i: (i, 0)),
        compiler_params=pltpu.CompilerParams(
            dimension_semantics=("parallel",)),
    )(x_flat, w_packed, pool, w_cls2d, b_cls2d)

    # .squeeze(-1) from the PyTorch forward (and drop batch padding).
    # Note: for B==1 torch's `.squeeze()` would also drop the batch dim and
    # return a scalar; we always return shape (B,).
    return out[:B, 0]


def _reference(x_nchw, w_conv, b_conv, w_cls, b_cls):
    """Pure-JAX reference of the same forward pass (for verification)."""
    y = jax.lax.conv_general_dilated(
        x_nchw, w_conv, window_strides=(1, 1), padding=((1, 1), (1, 1)),
        dimension_numbers=("NCHW", "OIHW", "NCHW"))
    y = jnp.maximum(y + b_conv[None, :, None, None], 0.0)
    feat = y.mean(axis=(2, 3))                       # (B, Cout)  == squeeze()
    logit = feat @ w_cls.T + b_cls                   # (B, 1)
    return logit[:, 0]                               # squeeze(-1)


if __name__ == "__main__":
    B, Cin, H, W, Cout = 2, 4, 16, 16, 32

    key = jax.random.PRNGKey(0)
    k_x, k_wc, k_bc, k_wl, k_bl = jax.random.split(key, 5)

    x = jax.random.normal(k_x, (B, Cin, H, W), dtype=jnp.float32)
    w_conv = 0.1 * jax.random.normal(k_wc, (Cout, Cin, 3, 3), dtype=jnp.float32)
    b_conv = 0.1 * jax.random.normal(k_bc, (Cout,), dtype=jnp.float32)
    w_cls = 0.1 * jax.random.normal(k_wl, (1, Cout), dtype=jnp.float32)
    b_cls = 0.1 * jax.random.normal(k_bl, (1,), dtype=jnp.float32)

    # One-time static weight repacking (kept out of the per-call hot path).
    params = prepare_params(w_conv, b_conv, w_cls, b_cls)

    out = jax.block_until_ready(model_forward(x, *params))
    ref = jax.block_until_ready(_reference(x, w_conv, b_conv, w_cls, b_cls))

    assert out.shape == (B,), out.shape
    assert jnp.allclose(out, ref, atol=1e-4, rtol=1e-4), (out, ref)
    print("KERNEL_OK")
</pallas_src>

<mosaic_0001>
module attributes {stable_mosaic.version = 11 : i64} {
  func.func @_model_kernel(%arg0: i32, %arg1: memref<512x128xf32, #tpu.memory_space<vmem>>, %arg2: memref<128x32xf32, #tpu.memory_space<vmem>>, %arg3: memref<2x512xf32, #tpu.memory_space<vmem>>, %arg4: memref<32x1xf32, #tpu.memory_space<vmem>>, %arg5: memref<1x1xf32, #tpu.memory_space<vmem>>, %arg6: memref<2x1xf32, #tpu.memory_space<vmem>>) attributes {dimension_semantics = [#tpu.dimension_semantics<parallel>], iteration_bounds = array<i64: 1>, scalar_prefetch = 0 : i64, scratch_operands = 0 : i64, tpu.core_type = #tpu.core_type<tc>, window_params = [{transform_indices = @transform_0, window_bounds = array<i64: 512, 128>}, {pipeline_mode = #tpu.pipeline_mode<synchronous>, transform_indices = @transform_1, window_bounds = array<i64: 128, 32>}, {pipeline_mode = #tpu.pipeline_mode<synchronous>, transform_indices = @transform_2, window_bounds = array<i64: 2, 512>}, {pipeline_mode = #tpu.pipeline_mode<synchronous>, transform_indices = @transform_3, window_bounds = array<i64: 32, 1>}, {pipeline_mode = #tpu.pipeline_mode<synchronous>, transform_indices = @transform_4, window_bounds = array<i64: 1, 1>}, {transform_indices = @transform_5, window_bounds = array<i64: 2, 1>}]} {
    %c0 = arith.constant 0 : index
    %c0_0 = arith.constant 0 : index
    %0 = vector.load %arg1[%c0, %c0_0] : memref<512x128xf32, #tpu.memory_space<vmem>>, vector<512x128xf32>
    %c0_1 = arith.constant 0 : index
    %c0_2 = arith.constant 0 : index
    %1 = vector.load %arg2[%c0_1, %c0_2] : memref<128x32xf32, #tpu.memory_space<vmem>>, vector<128x32xf32>
    %cst = arith.constant dense<0.000000e+00> : vector<512x32xf32>
    %2 = tpu.matmul %0, %1, %cst {dimension_numbers = #tpu.dot_dimension_numbers<[1], [0], [0], [1], [0, 0, 1, 1], [], []>} : vector<512x128xf32>, vector<128x32xf32>, vector<512x32xf32> -> vector<512x32xf32>
    %cst_3 = arith.constant 0.000000e+00 : f32
    %3 = vector.broadcast %cst_3 : f32 to vector<512x32xf32>
    %4 = arith.maximumf %2, %3 : vector<512x32xf32>
    %c0_4 = arith.constant 0 : index
    %c0_5 = arith.constant 0 : index
    %5 = vector.load %arg3[%c0_4, %c0_5] : memref<2x512xf32, #tpu.memory_space<vmem>>, vector<2x512xf32>
    %cst_6 = arith.constant dense<0.000000e+00> : vector<2x32xf32>
    %6 = tpu.matmul %5, %4, %cst_6 {dimension_numbers = #tpu.dot_dimension_numbers<[1], [0], [0], [1], [0, 0, 1, 1], [], []>} : vector<2x512xf32>, vector<512x32xf32>, vector<2x32xf32> -> vector<2x32xf32>
    %c0_7 = arith.constant 0 : index
    %c0_8 = arith.constant 0 : index
    %7 = vector.load %arg4[%c0_7, %c0_8] : memref<32x1xf32, #tpu.memory_space<vmem>>, vector<32x1xf32>
    %cst_9 = arith.constant dense<0.000000e+00> : vector<2x1xf32>
    %8 = tpu.matmul %6, %7, %cst_9 {dimension_numbers = #tpu.dot_dimension_numbers<[1], [0], [0], [1], [0, 0, 1, 1], [], []>} : vector<2x32xf32>, vector<32x1xf32>, vector<2x1xf32> -> vector<2x1xf32>
    %c0_10 = arith.constant 0 : index
    %c0_11 = arith.constant 0 : index
    %9 = vector.load %arg5[%c0_10, %c0_11] : memref<1x1xf32, #tpu.memory_space<vmem>>, vector<1x1xf32>
    %10 = vector.broadcast %9 : vector<1x1xf32> to vector<2x1xf32>
    %11 = arith.addf %8, %10 : vector<2x1xf32>
    %c0_12 = arith.constant 0 : index
    %c0_13 = arith.constant 0 : index
    %12 = vector.load %arg6[%c0_12, %c0_13] : memref<2x1xf32, #tpu.memory_space<vmem>>, vector<2x1xf32>
    tpu.vector_store %arg6[%c0_12, %c0_13], %11 {strides = array<i32>} : memref<2x1xf32, #tpu.memory_space<vmem>>, vector<2x1xf32>,
    return
  }
  func.func @transform_0(%arg0: i32) -> (i32, i32) {
    %c0_i32 = arith.constant 0 : i32
    %c0_i32_0 = arith.constant 0 : i32
    return %arg0, %c0_i32 : i32, i32
  }
  func.func @transform_1(%arg0: i32) -> (i32, i32) {
    %c0_i32 = arith.constant 0 : i32
    %c0_i32_0 = arith.constant 0 : i32
    %c0_i32_1 = arith.constant 0 : i32
    return %c0_i32, %c0_i32_0 : i32, i32
  }
  func.func @transform_2(%arg0: i32) -> (i32, i32) {
    %c0_i32 = arith.constant 0 : i32
    %c0_i32_0 = arith.constant 0 : i32
    %c0_i32_1 = arith.constant 0 : i32
    return %c0_i32, %c0_i32_0 : i32, i32
  }
  func.func @transform_3(%arg0: i32) -> (i32, i32) {
    %c0_i32 = arith.constant 0 : i32
    %c0_i32_0 = arith.constant 0 : i32
    %c0_i32_1 = arith.constant 0 : i32
    return %c0_i32, %c0_i32_0 : i32, i32
  }
  func.func @transform_4(%arg0: i32) -> (i32, i32) {
    %c0_i32 = arith.constant 0 : i32
    %c0_i32_0 = arith.constant 0 : i32
    %c0_i32_1 = arith.constant 0 : i32
    return %c0_i32, %c0_i32_0 : i32, i32
  }
  func.func @transform_5(%arg0: i32) -> (i32, i32) {
    %c0_i32 = arith.constant 0 : i32
    %c0_i32_0 = arith.constant 0 : i32
    return %arg0, %c0_i32 : i32, i32
  }
}

</mosaic_0001>

<bundles_post_ra>
// kernel: model_forward.1
= control target key start
LH: loop header
LB: loop body
LE: loop exit
PB: predicated region body
PF: predicated region fallthrough
CT: control target
= control target key end

     0   :  { %vm1226_vm0 = vmmov 0   ;;  %vm725_vm1 = vcmask 261120   ;;  %vm799_vm2 = vcmask 1024   ;;  %s1583_s1 = inlined_call_operand.vmem [shape: f32[128,32], index: 1, kind: input, shape index: {}]   ;;  %s1584_s0 = inlined_call_operand.vmem [shape: f32[512,128], index: 0, kind: input, shape index: {}]   ;;  %s1585_s2 = inlined_call_operand.vmem [shape: f32[2,512], index: 2, kind: input, shape index: {}]   ;;  %s1586_s3 = inlined_call_operand.vmem [shape: f32[32,1], index: 3, kind: input, shape index: {}]   ;;  %s1587_s4 = inlined_call_operand.<no memory space> [shape: f32[1,1], index: 4, kind: input, shape index: {}]   ;;  %s1588_s5 = inlined_call_operand.vmem [shape: f32[2,1], index: 5, kind: output, shape index: {}]  }
   0x1   :  { %v86_v0 = vld [vmem:[%s1583_s1] sm:$0xff]  ;;  %v87_v1 = vld [vmem:[%s1583_s1 + $0x8] sm:$0xff]  ;;  %v88_v2 = vld [vmem:[%s1583_s1 + $0x10] sm:$0xff] }
   0x2   :  { %v1101_v3 = vpack.c.bf16 %v87_v1, %v86_v0  ;;  %v89_v4 = vld [vmem:[%s1583_s1 + $0x18] sm:$0xff]  ;;  %v90_v6 = vld [vmem:[%s1583_s1 + $0x20] sm:$0xff]  ;;  %v91_v7 = vld [vmem:[%s1583_s1 + $0x28] sm:$0xff] }
   0x3   :  { %v1105_v5 = vpack.c.bf16 %v89_v4, %v88_v2  ;;  %v1109_v8 = vpack.c.bf16 %v91_v7, %v90_v6  ;;  %v22_v9 = vld [vmem:[%s1584_s0] sm:$0xff]  ;;  %v92_v10 = vld [vmem:[%s1583_s1 + $0x30] sm:$0xff]  ;;  %v93_v11 = vld [vmem:[%s1583_s1 + $0x38] sm:$0xff] }
   0x4   :  { %1102 = vmatprep.subr.bf16.mxu0 %v1101_v3  ;;  %1203 = vmatprep.subr.bf16.mxu1 %v1101_v3  ;;  %v1113_v12 = vpack.c.bf16 %v93_v11, %v92_v10  ;;  %v94_v13 = vld [vmem:[%s1583_s1 + $0x40] sm:$0xff]  ;;  %v95_v14 = vld [vmem:[%s1583_s1 + $0x48] sm:$0xff]  ;;  %v96_v16 = vld [vmem:[%s1583_s1 + $0x50] sm:$0xff] }
   0x5   :  { %1104 = vmatpush3.bf16.msra.mxu0 %v1101_v3  ;;  %1211 = vmatpush3.bf16.msra.mxu1 %v1101_v3  ;;  %v1117_v15 = vpack.c.bf16 %v95_v14, %v94_v13  ;;  %v97_v17 = vld [vmem:[%s1583_s1 + $0x58] sm:$0xff]  ;;  %v66_v18 = vld [vmem:[%s1584_s0 + $0x160] sm:$0xff]  ;;  %v99_v21 = vld [vmem:[%s1583_s1 + $0x68] sm:$0xff] }
   0x6   :  { %1106 = vmatprep.subr.bf16.mxu0 %v1105_v5  ;;  %1204 = vmatprep.subr.bf16.mxu1 %v1105_v5  ;;  %v1121_v19 = vpack.c.bf16 %v97_v17, %v96_v16  ;;  %v98_v20 = vld [vmem:[%s1583_s1 + $0x60] sm:$0xff]  ;;  %v100_v23 = vld [vmem:[%s1583_s1 + $0x70] sm:$0xff]  ;;  %v101_v24 = vld [vmem:[%s1583_s1 + $0x78] sm:$0xff] }
   0x7   :  { %994 = vmatprep.mubr.f32.mxu0 %v22_v9  ;;  %1060 = vmatprep.mubr.f32.mxu1 %v66_v18  ;;  %v1125_v22 = vpack.c.bf16 %v99_v21, %v98_v20  ;;  %v1129_v25 = vpack.c.bf16 %v101_v24, %v100_v23  ;;  %v23_v26 = vld [vmem:[%s1584_s0 + $0x8] sm:$0xff]  ;;  %v24_v28 = vld [vmem:[%s1584_s0 + $0x10] sm:$0xff]  ;;  %v25_v30 = vld [vmem:[%s1584_s0 + $0x18] sm:$0xff]  ;;  %v1224_v24 = vmov 1983009808  }
   0x8   :  { %v67_v27 = vld [vmem:[%s1584_s0 + $0x168] sm:$0xff]  ;;  %v68_v29 = vld [vmem:[%s1584_s0 + $0x170] sm:$0xff]  ;;  %v69_v31 = vld [vmem:[%s1584_s0 + $0x178] sm:$0xff] }
   0x9   :  { %1108 = vmatpush3.bf16.msra.mxu0 %v1105_v5  ;;  %1212 = vmatpush3.bf16.msra.mxu1 %v1105_v5  ;;  %v26_v32 = vld [vmem:[%s1584_s0 + $0x20] sm:$0xff]  ;;  %v27_v34 = vld [vmem:[%s1584_s0 + $0x28] sm:$0xff]  ;;  %v28_v36 = vld [vmem:[%s1584_s0 + $0x30] sm:$0xff] }
   0xa   :  { %1110 = vmatprep.subr.bf16.mxu0 %v1109_v8  ;;  %1205 = vmatprep.subr.bf16.mxu1 %v1109_v8  ;;  %v70_v33 = vld [vmem:[%s1584_s0 + $0x180] sm:$0xff]  ;;  %v71_v35 = vld [vmem:[%s1584_s0 + $0x188] sm:$0xff]  ;;  %v72_v37 = vld [vmem:[%s1584_s0 + $0x190] sm:$0xff] }
   0xb   :  { %v29_v38 = vld [vmem:[%s1584_s0 + $0x38] sm:$0xff]  ;;  %v30_v40 = vld [vmem:[%s1584_s0 + $0x40] sm:$0xff]  ;;  %v31_v42 = vld [vmem:[%s1584_s0 + $0x48] sm:$0xff] }
   0xc   :  { %v73_v39 = vld [vmem:[%s1584_s0 + $0x198] sm:$0xff]  ;;  %v74_v41 = vld [vmem:[%s1584_s0 + $0x1a0] sm:$0xff]  ;;  %v75_v43 = vld [vmem:[%s1584_s0 + $0x1a8] sm:$0xff] }
   0xd   :  { %1112 = vmatpush3.bf16.msra.mxu0 %v1109_v8  ;;  %1213 = vmatpush3.bf16.msra.mxu1 %v1109_v8  ;;  %v32_v44 = vld [vmem:[%s1584_s0 + $0x50] sm:$0xff]  ;;  %v33_v46 = vld [vmem:[%s1584_s0 + $0x58] sm:$0xff]  ;;  %v34_v48 = vld [vmem:[%s1584_s0 + $0x60] sm:$0xff] }
   0xe   :  { %1114 = vmatprep.subr.bf16.mxu0 %v1113_v12  ;;  %1206 = vmatprep.subr.bf16.mxu1 %v1113_v12  ;;  %v76_v45 = vld [vmem:[%s1584_s0 + $0x1b0] sm:$0xff]  ;;  %v77_v47 = vld [vmem:[%s1584_s0 + $0x1b8] sm:$0xff]  ;;  %v78_v49 = vld [vmem:[%s1584_s0 + $0x1c0] sm:$0xff] }
   0xf   :  { %v35_v50 = vld [vmem:[%s1584_s0 + $0x68] sm:$0xff]  ;;  %v36_v52 = vld [vmem:[%s1584_s0 + $0x70] sm:$0xff]  ;;  %v37_v54 = vld [vmem:[%s1584_s0 + $0x78] sm:$0xff] }
  0x10   :  { %v79_v51 = vld [vmem:[%s1584_s0 + $0x1c8] sm:$0xff]  ;;  %v80_v53 = vld [vmem:[%s1584_s0 + $0x1d0] sm:$0xff]  ;;  %v81_v55 = vld [vmem:[%s1584_s0 + $0x1d8] sm:$0xff] }
  0x11   :  { %1116 = vmatpush3.bf16.msra.mxu0 %v1113_v12  ;;  %1214 = vmatpush3.bf16.msra.mxu1 %v1113_v12  ;;  %v38_v56 = vld [vmem:[%s1584_s0 + $0x80] sm:$0xff]  ;;  %v39_v58 = vld [vmem:[%s1584_s0 + $0x88] sm:$0xff]  ;;  %v40_v60 = vld [vmem:[%s1584_s0 + $0x90] sm:$0xff] }
  0x12   :  { %1118 = vmatprep.subr.bf16.mxu0 %v1117_v15  ;;  %1207 = vmatprep.subr.bf16.mxu1 %v1117_v15  ;;  %v82_v57 = vld [vmem:[%s1584_s0 + $0x1e0] sm:$0xff]  ;;  %v83_v59 = vld [vmem:[%s1584_s0 + $0x1e8] sm:$0xff]  ;;  %v84_v61 = vld [vmem:[%s1584_s0 + $0x1f0] sm:$0xff] }
  0x13   :  { %v41_v62 = vld [vmem:[%s1584_s0 + $0x98] sm:$0xff]  ;;  %v42_v0 = vld [vmem:[%s1584_s0 + $0xa0] sm:$0xff]  ;;  %v43_v1 = vld [vmem:[%s1584_s0 + $0xa8] sm:$0xff] }
  0x14   :  { %v85_v63 = vld [vmem:[%s1584_s0 + $0x1f8] sm:$0xff]  ;;  %v44_v2 = vld [vmem:[%s1584_s0 + $0xb0] sm:$0xff]  ;;  %v46_v4 = vld [vmem:[%s1584_s0 + $0xc0] sm:$0xff] }
  0x15   :  { %1120 = vmatpush3.bf16.msra.mxu0 %v1117_v15  ;;  %1215 = vmatpush3.bf16.msra.mxu1 %v1117_v15  ;;  %v45_v3 = vld [vmem:[%s1584_s0 + $0xb8] sm:$0xff]  ;;  %v47_v5 = vld [vmem:[%s1584_s0 + $0xc8] sm:$0xff]  ;;  %v48_v6 = vld [vmem:[%s1584_s0 + $0xd0] sm:$0xff] }
  0x16   :  { %1122 = vmatprep.subr.bf16.mxu0 %v1121_v19  ;;  %1208 = vmatprep.subr.bf16.mxu1 %v1121_v19  ;;  %v49_v7 = vld [vmem:[%s1584_s0 + $0xd8] sm:$0xff]  ;;  %v50_v8 = vld [vmem:[%s1584_s0 + $0xe0] sm:$0xff]  ;;  %v51_v9 = vld [vmem:[%s1584_s0 + $0xe8] sm:$0xff] }
  0x17   :  { %v52_v10 = vld [vmem:[%s1584_s0 + $0xf0] sm:$0xff]  ;;  %v53_v11 = vld [vmem:[%s1584_s0 + $0xf8] sm:$0xff]  ;;  %v54_v12 = vld [vmem:[%s1584_s0 + $0x100] sm:$0xff] }
  0x18   :  { %v55_v13 = vld [vmem:[%s1584_s0 + $0x108] sm:$0xff]  ;;  %v56_v14 = vld [vmem:[%s1584_s0 + $0x110] sm:$0xff]  ;;  %v57_v15 = vld [vmem:[%s1584_s0 + $0x118] sm:$0xff] }
  0x19   :  { %1124 = vmatpush3.bf16.msra.mxu0 %v1121_v19  ;;  %1216 = vmatpush3.bf16.msra.mxu1 %v1121_v19  ;;  %v58_v16 = vld [vmem:[%s1584_s0 + $0x120] sm:$0xff]  ;;  %v59_v17 = vld [vmem:[%s1584_s0 + $0x128] sm:$0xff]  ;;  %v60_v18 = vld [vmem:[%s1584_s0 + $0x130] sm:$0xff] }
  0x1a   :  { %1126 = vmatprep.subr.bf16.mxu0 %v1125_v22  ;;  %1209 = vmatprep.subr.bf16.mxu1 %v1125_v22  ;;  %v61_v19 = vld [vmem:[%s1584_s0 + $0x138] sm:$0xff]  ;;  %v62_v20 = vld [vmem:[%s1584_s0 + $0x140] sm:$0xff]  ;;  %v63_v21 = vld [vmem:[%s1584_s0 + $0x148] sm:$0xff] }
  0x1b   :  { %v65_v23 = vld [vmem:[%s1584_s0 + $0x158] sm:$0xff] }
  0x1d   :  { %1128 = vmatpush3.bf16.msra.mxu0 %v1125_v22  ;;  %1217 = vmatpush3.bf16.msra.mxu1 %v1125_v22  ;;  %v64_v22 = vld [vmem:[%s1584_s0 + $0x150] sm:$0xff] }
  0x1e   :  { %1130 = vmatprep.subr.bf16.mxu0 %v1129_v25  ;;  %1210 = vmatprep.subr.bf16.mxu1 %v1129_v25 }
  0x21   :  { %1132 = vmatpush3.bf16.msra.mxu0 %v1129_v25  ;;  %1218 = vmatpush3.bf16.msra.mxu1 %v1129_v25  ;;  %v555_v25 = vunpack.c.l.s4 %v1224_v24 }
  0x24   :  { %995 = vmatmul.mubr.f32.vlgmr.msra.gmra.mrb[0].mxu0 %v23_v26  ;;  %1061 = vmatmul.mubr.f32.vlgmr.msra.gmra.mrb[0].mxu1 %v67_v27  ;;  %v557_v26 = vlaneseq  ;;  %v556_v27 = vunpack.c.0.s8 %v555_v25 }
  0x25   :  { %997 = vmatprep.mubr.f32.mxu0 %v24_v28  ;;  %1063 = vmatprep.mubr.f32.mxu1 %v68_v29 }
  0x26   :  { %v558_v28 = vshrl.u32 %v557_v26, 7 }
  0x28   :  { %998 = vmatmul.mubr.f32.gmra.mrb[2].mxu0 %v25_v30  ;;  %1064 = vmatmul.mubr.f32.gmra.mrb[2].mxu1 %v69_v31  ;;  %v559_v29 = vsub.s32 %v556_v27, %v558_v28  ;;  %v551_v30 = vld [vmem:[%s1585_s2] sm:$0xff] }
  0x29   :  { %1000 = vmatprep.mubr.f32.mxu0 %v26_v32  ;;  %1066 = vmatprep.mubr.f32.mxu1 %v70_v33  ;;  %v553_v33 = vcombine.high %v551_v30, %v551_v30 }
  0x2a   :  { %v1501_v31 = vrot.slane %v551_v30, %v559_v29 }
  0x2c   :  { %1001 = vmatmul.mubr.f32.gmra.mrb[4].mxu0 %v27_v34  ;;  %1067 = vmatmul.mubr.f32.gmra.mrb[4].mxu1 %v71_v35  ;;  %v568_v32 = vcombine.high %v1501_v31, %v1501_v31  ;;  %v1505_v34 = vrot.slane %v553_v33, %v559_v29 }
  0x2d   :  { %1003 = vmatprep.mubr.f32.mxu0 %v28_v36  ;;  %1069 = vmatprep.mubr.f32.mxu1 %v72_v37 }
  0x30   :  { %1004 = vmatmul.mubr.f32.gmra.mrb[6].mxu0 %v29_v38  ;;  %1070 = vmatmul.mubr.f32.gmra.mrb[6].mxu1 %v73_v39 }
  0x31   :  { %1006 = vmatprep.mubr.f32.mxu0 %v30_v40  ;;  %1072 = vmatprep.mubr.f32.mxu1 %v74_v41 }
  0x34   :  { %1007 = vmatmul.mubr.f32.gmra.mrb[8].mxu0 %v31_v42  ;;  %1073 = vmatmul.mubr.f32.gmra.mrb[8].mxu1 %v75_v43 }
  0x35   :  { %1009 = vmatprep.mubr.f32.mxu0 %v32_v44  ;;  %1075 = vmatprep.mubr.f32.mxu1 %v76_v45 }
  0x38   :  { %1010 = vmatmul.mubr.f32.gmra.mrb[10].mxu0 %v33_v46  ;;  %1076 = vmatmul.mubr.f32.gmra.mrb[10].mxu1 %v77_v47 }
  0x39   :  { %1012 = vmatprep.mubr.f32.mxu0 %v34_v48  ;;  %1078 = vmatprep.mubr.f32.mxu1 %v78_v49 }
  0x3c   :  { %1013 = vmatmul.mubr.f32.gmra.mrb[12].mxu0 %v35_v50  ;;  %1079 = vmatmul.mubr.f32.gmra.mrb[12].mxu1 %v79_v51 }
  0x3d   :  { %1015 = vmatprep.mubr.f32.mxu0 %v36_v52  ;;  %1081 = vmatprep.mubr.f32.mxu1 %v80_v53 }
  0x40   :  { %1016 = vmatmul.mubr.f32.gmra.mrb[14].mxu0 %v37_v54  ;;  %1082 = vmatmul.mubr.f32.gmra.mrb[14].mxu1 %v81_v55 }
  0x41   :  { %1018 = vmatprep.mubr.f32.mxu0 %v38_v56  ;;  %1084 = vmatprep.mubr.f32.mxu1 %v82_v57 }
  0x44   :  { %1019 = vmatmul.mubr.f32.gmra.mrb[16].mxu0 %v39_v58  ;;  %1085 = vmatmul.mubr.f32.gmra.mrb[16].mxu1 %v83_v59 }
  0x45   :  { %1021 = vmatprep.mubr.f32.mxu0 %v40_v60  ;;  %1087 = vmatprep.mubr.f32.mxu1 %v84_v61 }
  0x48   :  { %1022 = vmatmul.mubr.f32.gmra.mrb[18].mxu0 %v41_v62  ;;  %1088 = vmatmul.mubr.f32.gmra.mrb[18].mxu1 %v85_v63 }
  0x49   :  { %1024 = vmatprep.mubr.f32.mxu0 %v42_v0  ;;  %638 = vmatprep.mubr.f32.mxu1 %v568_v32 }
  0x4c   :  { %1025 = vmatmul.mubr.f32.gmra.mrb[20].mxu0 %v43_v1 }
  0x4d   :  { %1027 = vmatprep.mubr.f32.mxu0 %v44_v2 }
  0x50   :  { %1028 = vmatmul.mubr.f32.gmra.mrb[22].mxu0 %v45_v3 }
  0x51   :  { %1030 = vmatprep.mubr.f32.mxu0 %v46_v4 }
  0x54   :  { %1031 = vmatmul.mubr.f32.gmra.mrb[24].mxu0 %v47_v5 }
  0x55   :  { %1033 = vmatprep.mubr.f32.mxu0 %v48_v6 }
  0x58   :  { %1034 = vmatmul.mubr.f32.gmra.mrb[26].mxu0 %v49_v7 }
  0x59   :  { %1036 = vmatprep.mubr.f32.mxu0 %v50_v8 }
  0x5c   :  { %1037 = vmatmul.mubr.f32.gmra.mrb[28].mxu0 %v51_v9 }
  0x5d   :  { %1039 = vmatprep.mubr.f32.mxu0 %v52_v10 }
  0x60   :  { %1040 = vmatmul.mubr.f32.gmra.mrb[30].mxu0 %v53_v11 }
  0x61   :  { %1042 = vmatprep.mubr.f32.mxu0 %v54_v12 }
  0x64   :  { %1043 = vmatmul.mubr.f32.gmra.mrb[32].mxu0 %v55_v13 }
  0x65   :  { %1045 = vmatprep.mubr.f32.mxu0 %v56_v14 }
  0x68   :  { %1046 = vmatmul.mubr.f32.gmra.mrb[34].mxu0 %v57_v15 }
  0x69   :  { %1048 = vmatprep.mubr.f32.mxu0 %v58_v16 }
  0x6c   :  { %1049 = vmatmul.mubr.f32.gmra.mrb[36].mxu0 %v59_v17 }
  0x6d   :  { %1051 = vmatprep.mubr.f32.mxu0 %v60_v18 }
  0x70   :  { %1052 = vmatmul.mubr.f32.gmra.mrb[38].mxu0 %v61_v19 }
  0x71   :  { %1054 = vmatprep.mubr.f32.mxu0 %v62_v20 }
  0x74   :  { %1055 = vmatmul.mubr.f32.gmra.mrb[40].mxu0 %v63_v21 }
  0x75   :  { %1057 = vmatprep.mubr.f32.mxu0 %v64_v22 }
  0x78   :  { %1058 = vmatmul.mubr.f32.gmra.mrb[42].mxu0 %v65_v23 }
  0xf7   :  { %v996_v35 = vpop.f32.mrb[0].mxu0  ;;  %v1062_v36 = vpop.f32.mrb[0].mxu1 }
  0xf8   :  { %v488_v37 = vmax.f32 %v996_v35, 0.0  ;;  %v168_v38 = vpop.f32.mrb[1].mxu0  ;;  %v532_v39 = vmax.f32 %v1062_v36, 0.0  ;;  %v388_v40 = vpop.f32.mrb[1].mxu1 }
  0xf9   :  { %v487_v41 = vmax.f32 %v168_v38, 0.0  ;;  %v531_v42 = vmax.f32 %v388_v40, 0.0 }
  0xfb   :  { %v1507_v43 = vpack.c.bf16 %v488_v37, %v487_v41  ;;  %v999_v44 = vpop.f32.mrb[2].mxu0  ;;  %v1509_v45 = vpack.c.bf16 %v532_v39, %v531_v42  ;;  %v1065_v46 = vpop.f32.mrb[2].mxu1 }
  0xfc   :  { %v490_v47 = vmax.f32 %v999_v44, 0.0  ;;  %v178_v48 = vpop.f32.mrb[3].mxu0  ;;  %v534_v49 = vmax.f32 %v1065_v46, 0.0  ;;  %v398_v50 = vpop.f32.mrb[3].mxu1 }
  0xfd   :  { %v489_v51 = vmax.f32 %v178_v48, 0.0  ;;  %v533_v52 = vmax.f32 %v398_v50, 0.0 }
  0xff   :  { %v1511_v53 = vpack.c.bf16 %v490_v47, %v489_v51  ;;  %v1002_v54 = vpop.f32.mrb[4].mxu0  ;;  %v1513_v55 = vpack.c.bf16 %v534_v49, %v533_v52  ;;  %v1068_v56 = vpop.f32.mrb[4].mxu1 }
 0x100   :  { %v492_v57 = vmax.f32 %v1002_v54, 0.0  ;;  %v188_v58 = vpop.f32.mrb[5].mxu0  ;;  %v536_v59 = vmax.f32 %v1068_v56, 0.0  ;;  %v408_v60 = vpop.f32.mrb[5].mxu1 }
 0x101   :  { %v491_v61 = vmax.f32 %v188_v58, 0.0  ;;  %v535_v62 = vmax.f32 %v408_v60, 0.0 }
 0x103   :  { %v1515_v63 = vpack.c.bf16 %v492_v57, %v491_v61  ;;  %v1005_v0 = vpop.f32.mrb[6].mxu0  ;;  %v1517_v1 = vpack.c.bf16 %v536_v59, %v535_v62  ;;  %v1071_v2 = vpop.f32.mrb[6].mxu1 }
 0x104   :  { %v494_v3 = vmax.f32 %v1005_v0, 0.0  ;;  %v198_v4 = vpop.f32.mrb[7].mxu0  ;;  %v538_v5 = vmax.f32 %v1071_v2, 0.0  ;;  %v418_v6 = vpop.f32.mrb[7].mxu1 }
 0x105   :  { %v493_v7 = vmax.f32 %v198_v4, 0.0  ;;  %v537_v8 = vmax.f32 %v418_v6, 0.0 }
 0x107   :  { %v1519_v9 = vpack.c.bf16 %v494_v3, %v493_v7  ;;  %v1008_v10 = vpop.f32.mrb[8].mxu0  ;;  %v1521_v11 = vpack.c.bf16 %v538_v5, %v537_v8  ;;  %v1074_v12 = vpop.f32.mrb[8].mxu1 }
 0x108   :  { %v496_v13 = vmax.f32 %v1008_v10, 0.0  ;;  %v208_v14 = vpop.f32.mrb[9].mxu0  ;;  %v540_v15 = vmax.f32 %v1074_v12, 0.0  ;;  %v428_v16 = vpop.f32.mrb[9].mxu1 }
 0x109   :  { %v495_v17 = vmax.f32 %v208_v14, 0.0  ;;  %v539_v18 = vmax.f32 %v428_v16, 0.0 }
 0x10b   :  { %v1523_v19 = vpack.c.bf16 %v496_v13, %v495_v17  ;;  %v1011_v20 = vpop.f32.mrb[10].mxu0  ;;  %v1525_v21 = vpack.c.bf16 %v540_v15, %v539_v18  ;;  %v1077_v22 = vpop.f32.mrb[10].mxu1 }
 0x10c   :  { %v498_v23 = vmax.f32 %v1011_v20, 0.0  ;;  %v218_v24 = vpop.f32.mrb[11].mxu0  ;;  %v542_v25 = vmax.f32 %v1077_v22, 0.0  ;;  %v438_v26 = vpop.f32.mrb[11].mxu1 }
 0x10d   :  { %v497_v27 = vmax.f32 %v218_v24, 0.0  ;;  %v541_v28 = vmax.f32 %v438_v26, 0.0 }
 0x10f   :  { %v1527_v29 = vpack.c.bf16 %v498_v23, %v497_v27  ;;  %v1014_v30 = vpop.f32.mrb[12].mxu0  ;;  %v1529_v32 = vpack.c.bf16 %v542_v25, %v541_v28  ;;  %v1080_v33 = vpop.f32.mrb[12].mxu1 }
 0x110   :  { %v500_v35 = vmax.f32 %v1014_v30, 0.0  ;;  %v228_v36 = vpop.f32.mrb[13].mxu0  ;;  %v544_v37 = vmax.f32 %v1080_v33, 0.0  ;;  %v448_v38 = vpop.f32.mrb[13].mxu1 }
 0x111   :  { %v499_v39 = vmax.f32 %v228_v36, 0.0  ;;  %v543_v40 = vmax.f32 %v448_v38, 0.0 }
 0x113   :  { %v1531_v41 = vpack.c.bf16 %v500_v35, %v499_v39  ;;  %v1017_v42 = vpop.f32.mrb[14].mxu0  ;;  %v1533_v44 = vpack.c.bf16 %v544_v37, %v543_v40  ;;  %v1083_v46 = vpop.f32.mrb[14].mxu1 }
 0x114   :  { %v502_v47 = vmax.f32 %v1017_v42, 0.0  ;;  %v238_v48 = vpop.f32.mrb[15].mxu0  ;;  %v546_v49 = vmax.f32 %v1083_v46, 0.0  ;;  %v458_v50 = vpop.f32.mrb[15].mxu1 }
 0x115   :  { %v501_v51 = vmax.f32 %v238_v48, 0.0  ;;  %v545_v52 = vmax.f32 %v458_v50, 0.0 }
 0x117   :  { %v1535_v54 = vpack.c.bf16 %v502_v47, %v501_v51  ;;  %v1020_v56 = vpop.f32.mrb[16].mxu0  ;;  %v1537_v57 = vpack.c.bf16 %v546_v49, %v545_v52  ;;  %v1086_v58 = vpop.f32.mrb[16].mxu1 }
 0x118   :  { %v504_v59 = vmax.f32 %v1020_v56, 0.0  ;;  %v248_v60 = vpop.f32.mrb[17].mxu0  ;;  %v548_v61 = vmax.f32 %v1086_v58, 0.0  ;;  %v468_v62 = vpop.f32.mrb[17].mxu1 }
 0x119   :  { %v503_v0 = vmax.f32 %v248_v60, 0.0  ;;  %v547_v2 = vmax.f32 %v468_v62, 0.0  ;;  %v569_v60 = vcombine.high %v1505_v34, %v1505_v34 }
 0x11b   :  { %v1133_v3 = vpack.c.bf16 %v504_v59, %v503_v0  ;;  %v1023_v4 = vpop.f32.mrb[18].mxu0  ;;  %v1539_v5 = vpack.c.bf16 %v548_v61, %v547_v2  ;;  %v1089_v6 = vpop.f32.mrb[18].mxu1 }
 0x11c   :  { %v506_v7 = vmax.f32 %v1023_v4, 0.0  ;;  %v258_v8 = vpop.f32.mrb[19].mxu0  ;;  %v550_v10 = vmax.f32 %v1089_v6, 0.0  ;;  %v478_v12 = vpop.f32.mrb[19].mxu1 }
 0x11d   :  { %v505_v13 = vmax.f32 %v258_v8, 0.0  ;;  %1134 = vmatprep.subr.bf16.mxu1 %v1133_v3  ;;  %v549_v14 = vmax.f32 %v478_v12, 0.0 }
 0x11e   :  { %1136 = vmatpush3.bf16.msra.mxu1 %v1507_v43 }
 0x11f   :  { %v1137_v15 = vpack.c.bf16 %v506_v7, %v505_v13  ;;  %v1026_v16 = vpop.f32.mrb[20].mxu0  ;;  %v1542_v17 = vpack.c.bf16 %v550_v10, %v549_v14 }
 0x120   :  { %v508_v18 = vmax.f32 %v1026_v16, 0.0  ;;  %v268_v20 = vpop.f32.mrb[21].mxu0 }
 0x121   :  { %v507_v22 = vmax.f32 %v268_v20, 0.0  ;;  %1138 = vmatprep.subr.bf16.mxu1 %v1137_v15 }
 0x122   :  { %1140 = vmatpush3.bf16.msra.mxu1 %v1511_v53 }
 0x123   :  { %v1141_v23 = vpack.c.bf16 %v508_v18, %v507_v22  ;;  %v1029_v24 = vpop.f32.mrb[22].mxu0 }
 0x124   :  { %v510_v25 = vmax.f32 %v1029_v24, 0.0  ;;  %v278_v26 = vpop.f32.mrb[23].mxu0 }
 0x125   :  { %v509_v27 = vmax.f32 %v278_v26, 0.0  ;;  %1142 = vmatprep.subr.bf16.mxu1 %v1141_v23 }
 0x126   :  { %1144 = vmatpush3.bf16.msra.mxu1 %v1515_v63 }
 0x127   :  { %v1145_v28 = vpack.c.bf16 %v510_v25, %v509_v27  ;;  %v1032_v43 = vpop.f32.mrb[24].mxu0 }
 0x128   :  { %v512_v30 = vmax.f32 %v1032_v43, 0.0  ;;  %v288_v33 = vpop.f32.mrb[25].mxu0 }
 0x129   :  { %v511_v35 = vmax.f32 %v288_v33, 0.0  ;;  %1146 = vmatprep.subr.bf16.mxu1 %v1145_v28 }
 0x12a   :  { %1148 = vmatpush3.bf16.msra.mxu1 %v1519_v9 }
 0x12b   :  { %v1149_v36 = vpack.c.bf16 %v512_v30, %v511_v35  ;;  %v1035_v37 = vpop.f32.mrb[26].mxu0 }
 0x12c   :  { %v514_v38 = vmax.f32 %v1035_v37, 0.0  ;;  %v298_v53 = vpop.f32.mrb[27].mxu0 }
 0x12d   :  { %v513_v39 = vmax.f32 %v298_v53, 0.0  ;;  %1150 = vmatprep.subr.bf16.mxu1 %v1149_v36 }
 0x12e   :  { %1152 = vmatpush3.bf16.msra.mxu1 %v1523_v19 }
 0x12f   :  { %v1153_v40 = vpack.c.bf16 %v514_v38, %v513_v39  ;;  %v1038_v42 = vpop.f32.mrb[28].mxu0 }
 0x130   :  { %v516_v46 = vmax.f32 %v1038_v42, 0.0  ;;  %v308_v63 = vpop.f32.mrb[29].mxu0 }
 0x131   :  { %v515_v47 = vmax.f32 %v308_v63, 0.0  ;;  %1154 = vmatprep.subr.bf16.mxu1 %v1153_v40 }
 0x132   :  { %1156 = vmatpush3.bf16.msra.mxu1 %v1527_v29 }
 0x133   :  { %v1157_v48 = vpack.c.bf16 %v516_v46, %v515_v47  ;;  %v1041_v49 = vpop.f32.mrb[30].mxu0 }
 0x134   :  { %v518_v50 = vmax.f32 %v1041_v49, 0.0  ;;  %v318_v9 = vpop.f32.mrb[31].mxu0 }
 0x135   :  { %v517_v51 = vmax.f32 %v318_v9, 0.0  ;;  %1158 = vmatprep.subr.bf16.mxu1 %v1157_v48 }
 0x136   :  { %1160 = vmatpush3.bf16.msra.mxu1 %v1531_v41 }
 0x137   :  { %v1161_v52 = vpack.c.bf16 %v518_v50, %v517_v51  ;;  %v1044_v56 = vpop.f32.mrb[32].mxu0 }
 0x138   :  { %v520_v58 = vmax.f32 %v1044_v56, 0.0  ;;  %v328_v19 = vpop.f32.mrb[33].mxu0 }
 0x139   :  { %v519_v59 = vmax.f32 %v328_v19, 0.0  ;;  %1162 = vmatprep.subr.bf16.mxu1 %v1161_v52 }
 0x13a   :  { %1164 = vmatpush3.bf16.msra.mxu1 %v1535_v54 }
 0x13b   :  { %v1167_v29 = vpack.c.bf16 %v520_v58, %v519_v59  ;;  %v1047_v61 = vpop.f32.mrb[34].mxu0  ;;  %1166 = vmatprep.subr.bf16.mxu1 %v1517_v1 }
 0x13c   :  { %v522_v62 = vmax.f32 %v1047_v61, 0.0  ;;  %v338_v0 = vpop.f32.mrb[35].mxu0 }
 0x13d   :  { %v521_v2 = vmax.f32 %v338_v0, 0.0  ;;  %639 = vmatmul.mubr.f32.vlgmr.msra.gmra.mrb[20].mxu1 %v1501_v31 }
 0x13e   :  { %1168 = vmatpush3.bf16.msra.mxu1 %v1167_v29  ;;  %708 = vmatprep.mubr.f32.mxu1 %v569_v60 }
 0x13f   :  { %v1171_v41 = vpack.c.bf16 %v522_v62, %v521_v2  ;;  %v1050_v3 = vpop.f32.mrb[36].mxu0  ;;  %1170 = vmatprep.subr.bf16.mxu1 %v1521_v11 }
 0x140   :  { %v524_v4 = vmax.f32 %v1050_v3, 0.0  ;;  %v348_v54 = vpop.f32.mrb[37].mxu0 }
 0x141   :  { %v523_v6 = vmax.f32 %v348_v54, 0.0 }
 0x142   :  { %1172 = vmatpush3.bf16.msra.mxu1 %v1171_v41 }
 0x143   :  { %v1175_v7 = vpack.c.bf16 %v524_v4, %v523_v6  ;;  %v1053_v8 = vpop.f32.mrb[38].mxu0  ;;  %1174 = vmatprep.subr.bf16.mxu1 %v1525_v21 }
 0x144   :  { %v526_v1 = vmax.f32 %v1053_v8, 0.0  ;;  %v358_v10 = vpop.f32.mrb[39].mxu0 }
 0x145   :  { %v525_v12 = vmax.f32 %v358_v10, 0.0 }
 0x146   :  { %1176 = vmatpush3.bf16.msra.mxu1 %v1175_v7 }
 0x147   :  { %v1179_v13 = vpack.c.bf16 %v526_v1, %v525_v12  ;;  %v1056_v31 = vpop.f32.mrb[40].mxu0  ;;  %1178 = vmatprep.subr.bf16.mxu1 %v1529_v32  ;;  %v1225_v32 = vmov 0.0|0.0  }
 0x148   :  { %v528_v14 = vmax.f32 %v1056_v31, 0.0  ;;  %v368_v15 = vpop.f32.mrb[41].mxu0 }
 0x149   :  { %v527_v16 = vmax.f32 %v368_v15, 0.0 }
 0x14a   :  { %1180 = vmatpush3.bf16.msra.mxu1 %v1179_v13 }
 0x14b   :  { %v1183_v11 = vpack.c.bf16 %v528_v14, %v527_v16  ;;  %v1059_v18 = vpop.f32.mrb[42].mxu0  ;;  %1182 = vmatprep.subr.bf16.mxu1 %v1533_v44  ;;  %v714_v44 = vld [vmem:[%s1586_s3] sm:$0xff] }
 0x14c   :  { %v530_v20 = vmax.f32 %v1059_v18, 0.0  ;;  %v378_v22 = vpop.f32.mrb[43].mxu0 }
 0x14d   :  { %v529_v23 = vmax.f32 %v378_v22, 0.0 }
 0x14e   :  { %1184 = vmatpush3.bf16.msra.mxu1 %v1183_v11 }
 0x14f   :  { %v1187_v21 = vpack.c.bf16 %v530_v20, %v529_v23  ;;  %1186 = vmatprep.subr.bf16.mxu1 %v1537_v57  ;;  %v715_v57 = vld [vmem:[%s1586_s3 + $0x8] sm:$0xff] }
 0x150   :  { %v1198_v24 = vpack.c.bf16 %v715_v57, %v714_v44 }
 0x152   :  { %1188 = vmatpush3.bf16.msra.mxu1 %v1187_v21 }
 0x153   :  { %1190 = vmatprep.subr.bf16.mxu1 %v1539_v5  ;;  %v1227_v5 = vmov 0.0  }
 0x156   :  { %1192 = vmatpush3.bf16.msra.mxu1 %v1509_v45  ;;  %v716_v45 = vld [vmem:[%s1586_s3 + $0x10] sm:$0xff] }
 0x157   :  { %1194 = vmatprep.subr.bf16.mxu1 %v1542_v17  ;;  %v10_v17 = vstv %s1587_s4 }
 0x158   :  { %11 = vst [vmem:[#allocation2] sm:$0x1] %v10_v17 }
 0x15a   :  { %1196 = vmatpush3.bf16.msra.mxu1 %v1513_v55 }
 0x15b   :  { %1197 = vmatprep.subr.bf16.mxu1 %v1225_v32 }
 0x15d   :  { %709 = vmatmul.mubr.f32.vlgmr.msra.gmra.mrb[22].mxu1 %v1505_v34  ;;  %v717_v34 = vld [vmem:[%s1586_s3 + $0x18] sm:$0xff] }
 0x15e   :  { %1199 = vmatpush3.bf16.msra.mxu1 %v1198_v24  ;;  %v1201_v55 = vpack.c.bf16 %v717_v34, %v716_v45  ;;  %1098 = vmatprep.mubr.msk.f32.mxu1 %vm1226_vm0, %v1227_v5 }
 0x15f   :  { %1200 = vmatprep.subr.bf16.mxu1 %v1225_v32  ;;  %v805_v35 = vld [vmem:[#allocation2] ss:$0 sm:$0xff] }
 0x162   :  { %1202 = vmatpush3.bf16.msra.mxu1 %v1201_v55 }
 0x210   :  { %v919_v25 = vpop.f32.mrb[20].mxu1 }
 0x211   :  { %v920_v26 = vpop.f32.mrb[21].mxu1 }
 0x212   :  { %v921_v27 = vadd.f32 %v920_v26, %v919_v25 }
 0x230   :  { %v954_v28 = vpop.f32.mrb[22].mxu1 }
 0x231   :  { %v955_v43 = vpop.f32.mrb[23].mxu1 }
 0x232   :  { %v956_v30 = vadd.f32 %v955_v43, %v954_v28 }
 0x234   :  { %v711_v33 = vadd.f32 %v956_v30, %v921_v27 }
 0x236   :  { %1099 = vmatmul.mubr.msk.f32.vlgmr.msra.gmra.mrb[24].mxu1 %vm725_vm1, %v711_v33 }
 0x309   :  { %v795_v36 = vpop.f32.mrb[24].mxu1 }
 0x30a   :  { %v796_v37 = vadd.f32 %v805_v35, %v795_v36  ;;  %v1100_v38 = vpop.f32.mrb[25].mxu1 }
 0x30c   :  { %800 = vst.msk [vmem:[%s1588_s5] sm:$0x3] %vm799_vm2, %v796_v37 }

</bundles_post_ra>
